<compile_context>
chip_gen: v5e
topology: v5e:2x2
jax: 0.10.0
libtpu: 0.0.40
codegen_flags: <defaults>
</compile_context>

<pallas_src>
import functools

import jax
import jax.numpy as jnp
from jax import lax
from jax.experimental import pallas as pl
from jax.experimental.pallas import tpu as pltpu


def _round_up(x, m):
    return (x + m - 1) // m * m


def _supcon_kernel(
    fa_ref,      # (TB, Dp) f32  anchor-row feature tile
    fc_ref,      # (TC, Dp) f32  contrast-col feature tile
    labr_ref,    # (TB, 1)  i32  anchor-row labels
    labc_ref,    # (1, TC)  i32  contrast-col labels
    loss_ref,    # (TB, 1)  f32  per-row loss (0 for rows w/o positives / padding)
    valid_ref,   # (TB, 1)  f32  1.0 where the row participates in the mean
    fa_bf,       # scratch (TB, Dp) bf16  normalized anchors, reused across k
    m_acc,       # scratch (TB, 1) f32    running row max of anchor_dot_contrast
    den_acc,     # scratch (TB, 1) f32    running sum_{j != i} exp(adc - m)
    adcpos_acc,  # scratch (TB, 1) f32    running sum_j adc * pos
    npos_acc,    # scratch (TB, 1) f32    running sum_j pos
    *,
    temperature,
    scale_by_temperature,
    batch,
    tb,
    tc,
):
    i = pl.program_id(0)               # anchor tile (parallel)
    k = pl.program_id(1)               # contrast tile (reduction, "arbitrary")
    inv_t = 1.0 / temperature
    neg_big = jnp.float32(-1e30)

    @pl.when(k == 0)
    def _init():
        # F.normalize(features, p=2, dim=1); eps matches torch (1e-12 on the norm).
        fa = fa_ref[...].astype(jnp.float32)
        ssq = jnp.sum(fa * fa, axis=1, keepdims=True)
        fa_bf[...] = (fa * lax.rsqrt(jnp.maximum(ssq, 1e-24))).astype(jnp.bfloat16)
        m_acc[...] = jnp.full_like(m_acc, neg_big)
        den_acc[...] = jnp.zeros_like(den_acc)
        adcpos_acc[...] = jnp.zeros_like(adcpos_acc)
        npos_acc[...] = jnp.zeros_like(npos_acc)

    # Normalize the contrast tile (bf16 MXU operand, f32 accumulation).
    fc = fc_ref[...].astype(jnp.float32)
    ssq_c = jnp.sum(fc * fc, axis=1, keepdims=True)
    fc_bf = (fc * lax.rsqrt(jnp.maximum(ssq_c, 1e-24))).astype(jnp.bfloat16)

    # anchor_dot_contrast tile: cosine similarity of unit vectors / temperature.
    adc = lax.dot_general(
        fa_bf[...], fc_bf, (((1,), (1,)), ((), ())),
        preferred_element_type=jnp.float32,
    ) * inv_t                                                     # (TB, TC)

    # In-kernel masks: label equality, self-exclusion, padding validity.
    row_g = i * tb + lax.broadcasted_iota(jnp.int32, (tb, tc), 0)
    col_g = k * tc + lax.broadcasted_iota(jnp.int32, (tb, tc), 1)
    col_ok = col_g < batch
    not_self = row_g != col_g
    same = labr_ref[...] == labc_ref[...]                         # (TB,1)==(1,TC)

    adc = jnp.where(col_ok, adc, neg_big)        # padded columns never contribute
    not_self_f = jnp.where(not_self, 1.0, 0.0)
    pos_f = jnp.where(
        jnp.logical_and(same, jnp.logical_and(col_ok, not_self)), 1.0, 0.0)

    # Online (flash-style) row max + running exp-sum over j != i.
    m_tile = jnp.max(adc, axis=1, keepdims=True)
    m_new = jnp.maximum(m_acc[...], m_tile)
    alpha = jnp.exp(m_acc[...] - m_new)
    p = jnp.exp(adc - m_new)                     # 0 for padded columns
    den_acc[...] = alpha * den_acc[...] + jnp.sum(p * not_self_f, axis=1,
                                                  keepdims=True)
    m_acc[...] = m_new
    # sum_j logits*pos = sum_j adc*pos - m * n_pos  (max-independent accumulators)
    adcpos_acc[...] += jnp.sum(adc * pos_f, axis=1, keepdims=True)
    npos_acc[...] += jnp.sum(pos_f, axis=1, keepdims=True)

    @pl.when(k == pl.num_programs(1) - 1)
    def _finish():
        n_pos = npos_acc[...]
        row_ok = (i * tb + lax.broadcasted_iota(jnp.int32, (tb, 1), 0)) < batch
        valid = jnp.logical_and(n_pos > 0.0, row_ok)
        # sum_j log_probs*pos = sum_j adc*pos - (m + log(denominator)) * n_pos
        row_sum = adcpos_acc[...] - (m_acc[...] + jnp.log(den_acc[...])) * n_pos
        per_row = jnp.where(valid, row_sum / jnp.where(valid, n_pos, 1.0), 0.0)
        scale = temperature if scale_by_temperature else 1.0
        loss_ref[...] = -per_row * scale
        valid_ref[...] = jnp.where(valid, 1.0, 0.0)


def supcon_loss(features, labels, temperature=0.5, scale_by_temperature=True,
                block=256):
    """features: [B, D] float, labels: [B] int -> scalar float32 loss.

    `block` is the anchor/contrast tile size used when B > block: 256 suits
    v6e/v7x (2x256x256 MXU); use 128 on v5e. Must be a multiple of 128.
    """
    features = jnp.asarray(features, jnp.float32)
    labels = jnp.asarray(labels, jnp.int32)
    B, D = features.shape

    if B <= block:                       # single tile covering the whole batch
        tb = _round_up(B, 8)
        bp = tb
    else:
        assert block % 128 == 0, "block must be a multiple of 128"
        tb = block
        bp = _round_up(B, tb)
    dp = _round_up(D, 128)               # lane-dense feature loads / MXU K dim

    fpad = jnp.zeros((bp, dp), jnp.float32).at[:B, :D].set(features)
    lpad = jnp.full((bp,), jnp.iinfo(jnp.int32).min, jnp.int32).at[:B].set(labels)
    lab_rows = lpad.reshape(bp, 1)
    lab_cols = lpad.reshape(1, bp)

    na = bp // tb
    kernel = functools.partial(
        _supcon_kernel,
        temperature=float(temperature),
        scale_by_temperature=bool(scale_by_temperature),
        batch=B, tb=tb, tc=tb,
    )
    loss_rows, valid = pl.pallas_call(
        kernel,
        out_shape=(jax.ShapeDtypeStruct((bp, 1), jnp.float32),
                   jax.ShapeDtypeStruct((bp, 1), jnp.float32)),
        grid_spec=pltpu.PrefetchScalarGridSpec(
            num_scalar_prefetch=0,
            grid=(na, na),
            in_specs=[
                pl.BlockSpec((tb, dp), lambda i, k: (i, 0)),   # anchor rows
                pl.BlockSpec((tb, dp), lambda i, k: (k, 0)),   # contrast cols
                pl.BlockSpec((tb, 1), lambda i, k: (i, 0)),    # row labels
                pl.BlockSpec((1, tb), lambda i, k: (0, k)),    # col labels
            ],
            out_specs=[
                pl.BlockSpec((tb, 1), lambda i, k: (i, 0)),
                pl.BlockSpec((tb, 1), lambda i, k: (i, 0)),
            ],
            scratch_shapes=[
                pltpu.VMEM((tb, dp), jnp.bfloat16),
                pltpu.VMEM((tb, 1), jnp.float32),
                pltpu.VMEM((tb, 1), jnp.float32),
                pltpu.VMEM((tb, 1), jnp.float32),
                pltpu.VMEM((tb, 1), jnp.float32),
            ],
        ),
        compiler_params=pltpu.CompilerParams(
            dimension_semantics=("parallel", "arbitrary"),
            vmem_limit_bytes=48 * 1024 * 1024,
        ),
    )(fpad, fpad, lab_rows, lab_cols)

    # Tiny O(B) epilogue: mean over rows that have at least one positive.
    # (NaN if no row has positives — same as torch's .mean() of an empty tensor.)
    return jnp.sum(loss_rows) / jnp.sum(valid)


def _supcon_ref(features, labels, temperature=0.5, scale_by_temperature=True):
    """Pure-JAX (f32) reference for a sanity check."""
    f = features / jnp.maximum(
        jnp.linalg.norm(features, axis=1, keepdims=True), 1e-12)
    B = f.shape[0]
    mask = (labels.reshape(-1, 1) == labels.reshape(1, -1)).astype(jnp.float32)
    adc = (f @ f.T) / temperature
    logits = adc - jnp.max(adc, axis=1, keepdims=True)
    exp_logits = jnp.exp(logits)
    eye = jnp.eye(B, dtype=jnp.float32)
    pos = mask * (1.0 - eye)
    neg = 1.0 - mask
    npos = jnp.sum(pos, axis=1)
    denom = jnp.sum(exp_logits * neg, axis=1) + jnp.sum(exp_logits * pos, axis=1)
    log_probs = logits - jnp.log(denom)[:, None]
    row = jnp.sum(log_probs * pos, axis=1)
    valid = npos > 0
    per_row = jnp.where(valid, row / jnp.where(valid, npos, 1.0), 0.0)
    loss_rows = -per_row * (temperature if scale_by_temperature else 1.0)
    return (jnp.sum(jnp.where(valid, loss_rows, 0.0))
            / jnp.sum(valid.astype(jnp.float32)))


if __name__ == "__main__":
    key = jax.random.PRNGKey(0)
    kf, kl = jax.random.split(key)

    # Small, module-consistent shapes: batch=8, hidden=32.
    B, D = 8, 32
    features = jax.random.normal(kf, (B, D), dtype=jnp.float32)
    labels = jnp.arange(B, dtype=jnp.int32) % 3   # every row has a positive

    loss = supcon_loss(features, labels, temperature=0.5, scale_by_temperature=True)
    loss = jax.block_until_ready(loss)
    ref = _supcon_ref(features, labels, 0.5, True)
    # bf16 MXU operands => ~1e-3-level drift vs the f32 reference.
    assert jnp.allclose(loss, ref, atol=3e-2, rtol=3e-2), (loss, ref)

    # Also exercise the tiled (grid > 1) + padded path with a still-small batch.
    B2, D2 = 150, 40
    f2 = jax.random.normal(kl, (B2, D2), dtype=jnp.float32)
    l2 = jnp.arange(B2, dtype=jnp.int32) % 5
    loss2 = jax.block_until_ready(supcon_loss(f2, l2, 0.5, True, block=128))
    ref2 = _supcon_ref(f2, l2, 0.5, True)
    assert jnp.allclose(loss2, ref2, atol=3e-2, rtol=3e-2), (loss2, ref2)

    print("KERNEL_OK")
</pallas_src>

<mosaic_0001>
module attributes {stable_mosaic.version = 11 : i64} {
  func.func @_supcon_kernel(%arg0: i32, %arg1: i32, %arg2: memref<8x128xf32, #tpu.memory_space<vmem>>, %arg3: memref<8x128xf32, #tpu.memory_space<vmem>>, %arg4: memref<8x1xi32, #tpu.memory_space<vmem>>, %arg5: memref<1x8xi32, #tpu.memory_space<vmem>>, %arg6: memref<8x1xf32, #tpu.memory_space<vmem>>, %arg7: memref<8x1xf32, #tpu.memory_space<vmem>>, %arg8: memref<8x128xbf16, #tpu.memory_space<vmem>>, %arg9: memref<8x1xf32, #tpu.memory_space<vmem>>, %arg10: memref<8x1xf32, #tpu.memory_space<vmem>>, %arg11: memref<8x1xf32, #tpu.memory_space<vmem>>, %arg12: memref<8x1xf32, #tpu.memory_space<vmem>>) attributes {dimension_semantics = [#tpu.dimension_semantics<parallel>, #tpu.dimension_semantics<arbitrary>], iteration_bounds = array<i64: 1, 1>, scalar_prefetch = 0 : i64, scratch_operands = 5 : i64, tpu.core_type = #tpu.core_type<tc>, window_params = [{transform_indices = @transform_0, window_bounds = array<i64: 8, 128>}, {transform_indices = @transform_1, window_bounds = array<i64: 8, 128>}, {transform_indices = @transform_2, window_bounds = array<i64: 8, 1>}, {transform_indices = @transform_3, window_bounds = array<i64: 1, 8>}, {transform_indices = @transform_4, window_bounds = array<i64: 8, 1>}, {transform_indices = @transform_5, window_bounds = array<i64: 8, 1>}]} {
    %c0_i32 = arith.constant 0 : i32
    %0 = arith.cmpi eq, %arg1, %c0_i32 : i32
    %1 = arith.extui %0 : i1 to i32
    %cst = arith.constant -1.000000e+30 : f32
    %c0_i32_0 = arith.constant 0 : i32
    %2 = arith.cmpi ne, %1, %c0_i32_0 : i32
    scf.if %2 {
      %c0_43 = arith.constant 0 : index
      %c0_44 = arith.constant 0 : index
      %75 = vector.load %arg2[%c0_43, %c0_44] : memref<8x128xf32, #tpu.memory_space<vmem>>, vector<8x128xf32>
      %76 = arith.mulf %75, %75 : vector<8x128xf32>
      %cst_45 = arith.constant dense<0.000000e+00> : vector<8xf32>
      %77 = vector.multi_reduction <add>, %76, %cst_45 [1] : vector<8x128xf32> to vector<8xf32>
      %78 = vector.shape_cast %77 : vector<8xf32> to vector<8x1xf32>
      %cst_46 = arith.constant 1.000000e-24 : f32
      %79 = vector.broadcast %cst_46 : f32 to vector<8x1xf32>
      %80 = arith.maximumf %78, %79 : vector<8x1xf32>
      %81 = math.rsqrt %80 : vector<8x1xf32>
      %82 = vector.broadcast %81 : vector<8x1xf32> to vector<8x128xf32>
      %83 = arith.mulf %75, %82 : vector<8x128xf32>
      %84 = arith.truncf %83 : vector<8x128xf32> to vector<8x128xbf16>
      %c0_47 = arith.constant 0 : index
      %c0_48 = arith.constant 0 : index
      %85 = vector.load %arg8[%c0_47, %c0_48] : memref<8x128xbf16, #tpu.memory_space<vmem>>, vector<8x128xbf16>
      tpu.vector_store %arg8[%c0_47, %c0_48], %84 {strides = array<i32>} : memref<8x128xbf16, #tpu.memory_space<vmem>>, vector<8x128xbf16>,
      %86 = vector.broadcast %cst : f32 to vector<8x1xf32>
      %c0_49 = arith.constant 0 : index
      %c0_50 = arith.constant 0 : index
      %87 = vector.load %arg9[%c0_49, %c0_50] : memref<8x1xf32, #tpu.memory_space<vmem>>, vector<8x1xf32>
      tpu.vector_store %arg9[%c0_49, %c0_50], %86 {strides = array<i32>} : memref<8x1xf32, #tpu.memory_space<vmem>>, vector<8x1xf32>,
      %cst_51 = arith.constant 0.000000e+00 : f32
      %88 = vector.broadcast %cst_51 : f32 to vector<8x1xf32>
      %c0_52 = arith.constant 0 : index
      %c0_53 = arith.constant 0 : index
      %89 = vector.load %arg10[%c0_52, %c0_53] : memref<8x1xf32, #tpu.memory_space<vmem>>, vector<8x1xf32>
      tpu.vector_store %arg10[%c0_52, %c0_53], %88 {strides = array<i32>} : memref<8x1xf32, #tpu.memory_space<vmem>>, vector<8x1xf32>,
      %cst_54 = arith.constant 0.000000e+00 : f32
      %90 = vector.broadcast %cst_54 : f32 to vector<8x1xf32>
      %c0_55 = arith.constant 0 : index
      %c0_56 = arith.constant 0 : index
      %91 = vector.load %arg11[%c0_55, %c0_56] : memref<8x1xf32, #tpu.memory_space<vmem>>, vector<8x1xf32>
      tpu.vector_store %arg11[%c0_55, %c0_56], %90 {strides = array<i32>} : memref<8x1xf32, #tpu.memory_space<vmem>>, vector<8x1xf32>,
      %cst_57 = arith.constant 0.000000e+00 : f32
      %92 = vector.broadcast %cst_57 : f32 to vector<8x1xf32>
      %c0_58 = arith.constant 0 : index
      %c0_59 = arith.constant 0 : index
      %93 = vector.load %arg12[%c0_58, %c0_59] : memref<8x1xf32, #tpu.memory_space<vmem>>, vector<8x1xf32>
      tpu.vector_store %arg12[%c0_58, %c0_59], %92 {strides = array<i32>} : memref<8x1xf32, #tpu.memory_space<vmem>>, vector<8x1xf32>,
    } else {
    }
    %c0 = arith.constant 0 : index
    %c0_1 = arith.constant 0 : index
    %3 = vector.load %arg3[%c0, %c0_1] : memref<8x128xf32, #tpu.memory_space<vmem>>, vector<8x128xf32>
    %4 = arith.mulf %3, %3 : vector<8x128xf32>
    %cst_2 = arith.constant dense<0.000000e+00> : vector<8xf32>
    %5 = vector.multi_reduction <add>, %4, %cst_2 [1] : vector<8x128xf32> to vector<8xf32>
    %6 = vector.shape_cast %5 : vector<8xf32> to vector<8x1xf32>
    %cst_3 = arith.constant 1.000000e-24 : f32
    %7 = vector.broadcast %cst_3 : f32 to vector<8x1xf32>
    %8 = arith.maximumf %6, %7 : vector<8x1xf32>
    %9 = math.rsqrt %8 : vector<8x1xf32>
    %10 = vector.broadcast %9 : vector<8x1xf32> to vector<8x128xf32>
    %11 = arith.mulf %3, %10 : vector<8x128xf32>
    %12 = arith.truncf %11 : vector<8x128xf32> to vector<8x128xbf16>
    %c0_4 = arith.constant 0 : index
    %c0_5 = arith.constant 0 : index
    %13 = vector.load %arg8[%c0_4, %c0_5] : memref<8x128xbf16, #tpu.memory_space<vmem>>, vector<8x128xbf16>
    %cst_6 = arith.constant dense<0.000000e+00> : vector<8x8xf32>
    %14 = tpu.matmul %13, %12, %cst_6 {dimension_numbers = #tpu.dot_dimension_numbers<[1], [1], [0], [0], [0, 0, 1, 0], [], []>} : vector<8x128xbf16>, vector<8x128xbf16>, vector<8x8xf32> -> vector<8x8xf32>
    %cst_7 = arith.constant 2.000000e+00 : f32
    %15 = vector.broadcast %cst_7 : f32 to vector<8x8xf32>
    %16 = arith.mulf %14, %15 : vector<8x8xf32>
    %c8_i32 = arith.constant 8 : i32
    %17 = arith.muli %arg0, %c8_i32 : i32
    %18 = tpu.iota {dimensions = array<i32: 0>} : vector<8x8xi32>
    %19 = vector.broadcast %17 : i32 to vector<8x8xi32>
    %20 = arith.addi %19, %18 : vector<8x8xi32>
    %c8_i32_8 = arith.constant 8 : i32
    %21 = arith.muli %arg1, %c8_i32_8 : i32
    %22 = tpu.iota {dimensions = array<i32: 1>} : vector<8x8xi32>
    %23 = vector.broadcast %21 : i32 to vector<8x8xi32>
    %24 = arith.addi %23, %22 : vector<8x8xi32>
    %c8_i32_9 = arith.constant 8 : i32
    %25 = vector.broadcast %c8_i32_9 : i32 to vector<8x8xi32>
    %26 = arith.cmpi slt, %24, %25 : vector<8x8xi32>
    %27 = arith.cmpi ne, %20, %24 : vector<8x8xi32>
    %c0_10 = arith.constant 0 : index
    %c0_11 = arith.constant 0 : index
    %28 = vector.load %arg4[%c0_10, %c0_11] : memref<8x1xi32, #tpu.memory_space<vmem>>, vector<8x1xi32>
    %c0_12 = arith.constant 0 : index
    %c0_13 = arith.constant 0 : index
    %29 = vector.load %arg5[%c0_12, %c0_13] : memref<1x8xi32, #tpu.memory_space<vmem>>, vector<1x8xi32>
    %30 = vector.broadcast %28 : vector<8x1xi32> to vector<8x8xi32>
    %31 = vector.broadcast %29 : vector<1x8xi32> to vector<8x8xi32>
    %32 = arith.cmpi eq, %30, %31 : vector<8x8xi32>
    %cst_14 = arith.constant -1.000000e+30 : f32
    %33 = vector.broadcast %cst_14 : f32 to vector<8x8xf32>
    %34 = arith.select %26, %16, %33 : vector<8x8xi1>, vector<8x8xf32>
    %cst_15 = arith.constant 1.000000e+00 : f32
    %cst_16 = arith.constant 0.000000e+00 : f32
    %35 = vector.broadcast %cst_15 : f32 to vector<8x8xf32>
    %36 = vector.broadcast %cst_16 : f32 to vector<8x8xf32>
    %37 = arith.select %27, %35, %36 : vector<8x8xi1>, vector<8x8xf32>
    %38 = arith.andi %26, %27 : vector<8x8xi1>
    %39 = arith.andi %32, %38 : vector<8x8xi1>
    %cst_17 = arith.constant 1.000000e+00 : f32
    %cst_18 = arith.constant 0.000000e+00 : f32
    %40 = vector.broadcast %cst_17 : f32 to vector<8x8xf32>
    %41 = vector.broadcast %cst_18 : f32 to vector<8x8xf32>
    %42 = arith.select %39, %40, %41 : vector<8x8xi1>, vector<8x8xf32>
    %cst_19 = arith.constant dense<0xFF800000> : vector<8xf32>
    %43 = vector.multi_reduction <maximumf>, %34, %cst_19 [1] : vector<8x8xf32> to vector<8xf32>
    %44 = vector.shape_cast %43 : vector<8xf32> to vector<8x1xf32>
    %c0_20 = arith.constant 0 : index
    %c0_21 = arith.constant 0 : index
    %45 = vector.load %arg9[%c0_20, %c0_21] : memref<8x1xf32, #tpu.memory_space<vmem>>, vector<8x1xf32>
    %46 = arith.maximumf %45, %44 : vector<8x1xf32>
    %c0_22 = arith.constant 0 : index
    %c0_23 = arith.constant 0 : index
    %47 = vector.load %arg9[%c0_22, %c0_23] : memref<8x1xf32, #tpu.memory_space<vmem>>, vector<8x1xf32>
    %48 = arith.subf %47, %46 : vector<8x1xf32>
    %49 = math.exp %48 : vector<8x1xf32>
    %50 = vector.broadcast %46 : vector<8x1xf32> to vector<8x8xf32>
    %51 = arith.subf %34, %50 : vector<8x8xf32>
    %52 = math.exp %51 : vector<8x8xf32>
    %c0_24 = arith.constant 0 : index
    %c0_25 = arith.constant 0 : index
    %53 = vector.load %arg10[%c0_24, %c0_25] : memref<8x1xf32, #tpu.memory_space<vmem>>, vector<8x1xf32>
    %54 = arith.mulf %49, %53 : vector<8x1xf32>
    %55 = arith.mulf %52, %37 : vector<8x8xf32>
    %cst_26 = arith.constant dense<0.000000e+00> : vector<8xf32>
    %56 = vector.multi_reduction <add>, %55, %cst_26 [1] : vector<8x8xf32> to vector<8xf32>
    %57 = vector.shape_cast %56 : vector<8xf32> to vector<8x1xf32>
    %58 = arith.addf %54, %57 : vector<8x1xf32>
    %c0_27 = arith.constant 0 : index
    %c0_28 = arith.constant 0 : index
    %59 = vector.load %arg10[%c0_27, %c0_28] : memref<8x1xf32, #tpu.memory_space<vmem>>, vector<8x1xf32>
    tpu.vector_store %arg10[%c0_27, %c0_28], %58 {strides = array<i32>} : memref<8x1xf32, #tpu.memory_space<vmem>>, vector<8x1xf32>,
    %c0_29 = arith.constant 0 : index
    %c0_30 = arith.constant 0 : index
    %60 = vector.load %arg9[%c0_29, %c0_30] : memref<8x1xf32, #tpu.memory_space<vmem>>, vector<8x1xf32>
    tpu.vector_store %arg9[%c0_29, %c0_30], %46 {strides = array<i32>} : memref<8x1xf32, #tpu.memory_space<vmem>>, vector<8x1xf32>,
    %c0_31 = arith.constant 0 : index
    %c0_32 = arith.constant 0 : index
    %61 = vector.load %arg11[%c0_31, %c0_32] : memref<8x1xf32, #tpu.memory_space<vmem>>, vector<8x1xf32>
    %62 = arith.mulf %34, %42 : vector<8x8xf32>
    %cst_33 = arith.constant dense<0.000000e+00> : vector<8xf32>
    %63 = vector.multi_reduction <add>, %62, %cst_33 [1] : vector<8x8xf32> to vector<8xf32>
    %64 = vector.shape_cast %63 : vector<8xf32> to vector<8x1xf32>
    %65 = arith.addf %61, %64 : vector<8x1xf32>
    %c0_34 = arith.constant 0 : index
    %c0_35 = arith.constant 0 : index
    %66 = vector.load %arg11[%c0_34, %c0_35] : memref<8x1xf32, #tpu.memory_space<vmem>>, vector<8x1xf32>
    tpu.vector_store %arg11[%c0_34, %c0_35], %65 {strides = array<i32>} : memref<8x1xf32, #tpu.memory_space<vmem>>, vector<8x1xf32>,
    %c0_36 = arith.constant 0 : index
    %c0_37 = arith.constant 0 : index
    %67 = vector.load %arg12[%c0_36, %c0_37] : memref<8x1xf32, #tpu.memory_space<vmem>>, vector<8x1xf32>
    %cst_38 = arith.constant dense<0.000000e+00> : vector<8xf32>
    %68 = vector.multi_reduction <add>, %42, %cst_38 [1] : vector<8x8xf32> to vector<8xf32>
    %69 = vector.shape_cast %68 : vector<8xf32> to vector<8x1xf32>
    %70 = arith.addf %67, %69 : vector<8x1xf32>
    %c0_39 = arith.constant 0 : index
    %c0_40 = arith.constant 0 : index
    %71 = vector.load %arg12[%c0_39, %c0_40] : memref<8x1xf32, #tpu.memory_space<vmem>>, vector<8x1xf32>
    tpu.vector_store %arg12[%c0_39, %c0_40], %70 {strides = array<i32>} : memref<8x1xf32, #tpu.memory_space<vmem>>, vector<8x1xf32>,
    %c0_i32_41 = arith.constant 0 : i32
    %72 = arith.cmpi eq, %arg1, %c0_i32_41 : i32
    %73 = arith.extui %72 : i1 to i32
    %c0_i32_42 = arith.constant 0 : i32
    %74 = arith.cmpi ne, %73, %c0_i32_42 : i32
    scf.if %74 {
      %c0_43 = arith.constant 0 : index
      %c0_44 = arith.constant 0 : index
      %75 = vector.load %arg12[%c0_43, %c0_44] : memref<8x1xf32, #tpu.memory_space<vmem>>, vector<8x1xf32>
      %c8_i32_45 = arith.constant 8 : i32
      %76 = arith.muli %arg0, %c8_i32_45 : i32
      %77 = tpu.iota {dimensions = array<i32: 0>} : vector<8x1xi32>
      %78 = vector.broadcast %76 : i32 to vector<8x1xi32>
      %79 = arith.addi %78, %77 : vector<8x1xi32>
      %c8_i32_46 = arith.constant 8 : i32
      %80 = vector.broadcast %c8_i32_46 : i32 to vector<8x1xi32>
      %81 = arith.cmpi slt, %79, %80 : vector<8x1xi32>
      %cst_47 = arith.constant 0.000000e+00 : f32
      %82 = vector.broadcast %cst_47 : f32 to vector<8x1xf32>
      %83 = arith.cmpf ogt, %75, %82 : vector<8x1xf32>
      %84 = arith.andi %83, %81 : vector<8x1xi1>
      %c0_48 = arith.constant 0 : index
      %c0_49 = arith.constant 0 : index
      %85 = vector.load %arg11[%c0_48, %c0_49] : memref<8x1xf32, #tpu.memory_space<vmem>>, vector<8x1xf32>
      %c0_50 = arith.constant 0 : index
      %c0_51 = arith.constant 0 : index
      %86 = vector.load %arg9[%c0_50, %c0_51] : memref<8x1xf32, #tpu.memory_space<vmem>>, vector<8x1xf32>
      %c0_52 = arith.constant 0 : index
      %c0_53 = arith.constant 0 : index
      %87 = vector.load %arg10[%c0_52, %c0_53] : memref<8x1xf32, #tpu.memory_space<vmem>>, vector<8x1xf32>
      %88 = math.log %87 : vector<8x1xf32>
      %89 = arith.addf %86, %88 : vector<8x1xf32>
      %90 = arith.mulf %89, %75 : vector<8x1xf32>
      %91 = arith.subf %85, %90 : vector<8x1xf32>
      %cst_54 = arith.constant 1.000000e+00 : f32
      %92 = vector.broadcast %cst_54 : f32 to vector<8x1xf32>
      %93 = arith.select %84, %75, %92 : vector<8x1xi1>, vector<8x1xf32>
      %94 = arith.divf %91, %93 : vector<8x1xf32>
      %cst_55 = arith.constant 0.000000e+00 : f32
      %95 = vector.broadcast %cst_55 : f32 to vector<8x1xf32>
      %96 = arith.select %84, %94, %95 : vector<8x1xi1>, vector<8x1xf32>
      %cst_56 = arith.constant 0.000000e+00 : f32
      %97 = vector.broadcast %cst_56 : f32 to vector<8x1xf32>
      %98 = arith.subf %97, %96 : vector<8x1xf32>
      %cst_57 = arith.constant 5.000000e-01 : f32
      %99 = vector.broadcast %cst_57 : f32 to vector<8x1xf32>
      %100 = arith.mulf %98, %99 : vector<8x1xf32>
      %c0_58 = arith.constant 0 : index
      %c0_59 = arith.constant 0 : index
      %101 = vector.load %arg6[%c0_58, %c0_59] : memref<8x1xf32, #tpu.memory_space<vmem>>, vector<8x1xf32>
      tpu.vector_store %arg6[%c0_58, %c0_59], %100 {strides = array<i32>} : memref<8x1xf32, #tpu.memory_space<vmem>>, vector<8x1xf32>,
      %cst_60 = arith.constant 1.000000e+00 : f32
      %cst_61 = arith.constant 0.000000e+00 : f32
      %102 = vector.broadcast %cst_60 : f32 to vector<8x1xf32>
      %103 = vector.broadcast %cst_61 : f32 to vector<8x1xf32>
      %104 = arith.select %84, %102, %103 : vector<8x1xi1>, vector<8x1xf32>
      %c0_62 = arith.constant 0 : index
      %c0_63 = arith.constant 0 : index
      %105 = vector.load %arg7[%c0_62, %c0_63] : memref<8x1xf32, #tpu.memory_space<vmem>>, vector<8x1xf32>
      tpu.vector_store %arg7[%c0_62, %c0_63], %104 {strides = array<i32>} : memref<8x1xf32, #tpu.memory_space<vmem>>, vector<8x1xf32>,
    } else {
    }
    return
  }
  func.func @transform_0(%arg0: i32, %arg1: i32) -> (i32, i32) {
    %c0_i32 = arith.constant 0 : i32
    %c0_i32_0 = arith.constant 0 : i32
    return %arg0, %c0_i32 : i32, i32
  }
  func.func @transform_1(%arg0: i32, %arg1: i32) -> (i32, i32) {
    %c0_i32 = arith.constant 0 : i32
    %c0_i32_0 = arith.constant 0 : i32
    return %arg1, %c0_i32 : i32, i32
  }
  func.func @transform_2(%arg0: i32, %arg1: i32) -> (i32, i32) {
    %c0_i32 = arith.constant 0 : i32
    %c0_i32_0 = arith.constant 0 : i32
    return %arg0, %c0_i32 : i32, i32
  }
  func.func @transform_3(%arg0: i32, %arg1: i32) -> (i32, i32) {
    %c0_i32 = arith.constant 0 : i32
    %c0_i32_0 = arith.constant 0 : i32
    return %c0_i32, %arg1 : i32, i32
  }
  func.func @transform_4(%arg0: i32, %arg1: i32) -> (i32, i32) {
    %c0_i32 = arith.constant 0 : i32
    %c0_i32_0 = arith.constant 0 : i32
    return %arg0, %c0_i32 : i32, i32
  }
  func.func @transform_5(%arg0: i32, %arg1: i32) -> (i32, i32) {
    %c0_i32 = arith.constant 0 : i32
    %c0_i32_0 = arith.constant 0 : i32
    return %arg0, %c0_i32 : i32, i32
  }
}

</mosaic_0001>

<bundles_post_ra>
// kernel: tpu_custom_call.1
= control target key start
LH: loop header
LB: loop body
LE: loop exit
PB: predicated region body
PF: predicated region fallthrough
CT: control target
= control target key end

     0   :  { %11 = vsyncpa [#allocation8], 0  ;;  %s249_s21 = smov [#allocation7]   ;;  %s331_s0 = inlined_call_operand.vmem [shape: f32[8,128], index: 0, kind: input, shape index: {}]   ;;  %s332_s1 = inlined_call_operand.hbm [shape: f32[8,128], index: 1, kind: input, shape index: {}]   ;;  %s333_s2 = inlined_call_operand.vmem [shape: s32[8,1], index: 2, kind: input, shape index: {}]   ;;  %s334_s3 = inlined_call_operand.vmem [shape: s32[1,8], index: 3, kind: input, shape index: {}]   ;;  %s335_s4 = inlined_call_operand.vmem [shape: f32[8,1], index: 4, kind: output, shape index: {0}]   ;;  %s336_s5 = inlined_call_operand.vmem [shape: f32[8,1], index: 5, kind: output, shape index: {1}]  }
   0x1   :  { %s19_s20 = sshll.u32 %s332_s1, 4  ;;  %s21_s22 = sshll.u32 %s249_s21, 4  ;;  %s20_s20 = int_to_ptr.hbm [resolvable:$true] %s19_s20  ;;  %s22_s22 = int_to_ptr.vmem [resolvable:$true] %s21_s22 }
   0x2   :  { %24 = dma.hbm_to_vmem [thread:$0]  %s20_s20, 128, %s22_s22, [#allocation8]  }
   0x3   :  { %247 = dma.done.wait [#allocation8], 128  }
   0x4   :  { %248 = vsyncadd [#allocation8], 4294967168  ;;  %v38_v0 = vld [vmem:[%s331_s0] sm:$0xff]  ;;  %v94_v8 = vlaneseq  ;;  %v250_v11 = vmov 0   ;;  %vm56_vm7 = vcmask 7168   ;;  %v252_v33 = vmov 0.0  }
   0x5   :  { %v39_v1 = vmul.f32 %v38_v0, %v38_v0  ;;  %v61_v2 = vld [vmem:[#allocation7] sm:$0xff]  ;;  %208 = vset.pattern.permute.xlu2 %v250_v11  ;;  %207 = vset.pattern.permute.xlu1 %v250_v11  ;;  %v251_v32 = vmov -1e+30   ;;  %58 = vst.msk [vmem:[#allocation4] sm:$0xff] %vm56_vm7, %v252_v33  ;;  %vm117_vm8 = vcmask 64512  }
   0x6   :  { %v62_v3 = vmul.f32 %v61_v2, %v61_v2  ;;  %v105_v7 = vld [vmem:[%s333_s2] sm:$0xff]  ;;  %v292_v13 = vshrl.u32 %v94_v8, 7  ;;  %v294_v14 = vand.u32 127, %v94_v8  ;;  %209 = vset.pattern.permute.xlu0 %v250_v11  ;;  %57 = vst.msk [vmem:[#allocation3] sm:$0xff] %vm56_vm7, %v251_v32 }
   0x7   :  { %40 = vadd.xlane.f32.xlu0 %v39_v1  ;;  %108 = vperm.xlu2 %208, %v105_v7   ;;  %59 = vst.msk [vmem:[#allocation5] sm:$0xff] %vm56_vm7, %v252_v33  ;;  %v210_v39 = vld [vmem:[%s334_s3] ss:$0 sm:$0xff] }
   0x8   :  { %vm104_vm0 = vcmp.ne.s32.totalorder %v292_v13, %v294_v14  ;;  %60 = vst.msk [vmem:[#allocation6] sm:$0xff] %vm56_vm7, %v252_v33  ;;  %vm103_vm9 = vcmp.lt.s32.totalorder %v294_v14, 8 }
   0x9   :  { %vm114_vm10 = vmand %vm103_vm9, %vm104_vm0  ;;  %v113_v55 = vsel %vm104_vm0, 1.0, %v252_v33 }
   0xd   :  { %v121_v43 = vld [vmem:[#allocation3] sm:$0xff] }
   0xf   :  { %63 = vadd.xlane.f32.xlu0 %v62_v3  ;;  %v151_v48 = vld [vmem:[#allocation6] sm:$0xff] }
  0x61   :  { %v109_v40 = vpop.permute.xlu2 %108 }
  0x62   :  { %vm111_vm11 = vcmp.eq.s32.totalorder %v109_v40, %v210_v39 }
  0x63   :  { %vm115_vm12 = vmand %vm111_vm11, %vm114_vm10 }
  0x64   :  { %v116_v41 = vsel %vm115_vm12, 1.0, %v252_v33 }
  0x65   :  { %v152_v42 = vsel %vm117_vm8, %v116_v41, 0.0 }
  0x66   :  { %153 = vadd.xlane.f32.xlu2 %v152_v42 }
  0x7a   :  { %v41_v4 = vpop.xlane.xlu0 %40 }
  0x7b   :  { %v42_v5 = vmax.f32 %v41_v4, 1e-24 }
  0x7d   :  { %211 = vrsqrt.f32 %v42_v5  ;;  %vm49_vm2 = vweird.f32 %v42_v5 }
  0x82   :  { %v64_v6 = vpop.xlane.xlu0 %63 }
  0x83   :  { %v212_v9 = vpop.eup %211  ;;  %v65_v10 = vmax.f32 %v64_v6, 1e-24  ;;  %v144_v6 = vld [vmem:[#allocation5] sm:$0xff] }
  0x84   :  { %v44_v12 = vmul.f32 %v212_v9, %v42_v5  ;;  %vm50_vm1 = vweird.f32 %v212_v9 }
  0x85   :  { %213 = vrsqrt.f32 %v65_v10  ;;  %vm51_vm3 = vmor %vm49_vm2, %vm50_vm1  ;;  %vm72_vm5 = vweird.f32 %v65_v10 }
  0x86   :  { %v45_v15 = vmul.f32 %v212_v9, %v44_v12 }
  0x88   :  { %v46_v16 = vmul.f32 0.5, %v45_v15 }
  0x8a   :  { %v47_v17 = vsub.f32 1.5, %v46_v16 }
  0x8b   :  { %v214_v18 = vpop.eup %213 }
  0x8c   :  { %v48_v19 = vmul.f32 %v212_v9, %v47_v17  ;;  %v67_v20 = vmul.f32 %v214_v18, %v65_v10  ;;  %vm73_vm4 = vweird.f32 %v214_v18 }
  0x8d   :  { %vm74_vm6 = vmor %vm72_vm5, %vm73_vm4 }
  0x8e   :  { %v52_v21 = vsel %vm51_vm3, %v212_v9, %v48_v19  ;;  %v68_v22 = vmul.f32 %v214_v18, %v67_v20 }
  0x8f   :  { %v53_v23 = vmul.f32 %v52_v21, %v38_v0  ;;  %v134_v0 = vld [vmem:[#allocation4] sm:$0xff] }
  0x90   :  { %v69_v24 = vmul.f32 0.5, %v68_v22 }
  0x91   :  { %v54_v25 = vpack.c.bf16 %v53_v23, %v53_v23 }
  0x92   :  { %v70_v26 = vsub.f32 1.5, %v69_v24 }
  0x93   :  { %55 = vst [vmem:[#allocation2] sm:$0xf] %v54_v25 }
  0x94   :  { %v71_v27 = vmul.f32 %v214_v18, %v70_v26 }
  0x96   :  { %v75_v28 = vsel %vm74_vm6, %v214_v18, %v71_v27 }
  0x97   :  { %v76_v29 = vmul.f32 %v75_v28, %v61_v2 }
  0x99   :  { %v77_v30 = vpack.c.bf16 %v76_v29, %v76_v29 }
  0x9a   :  { %v78_v31 = vld [vmem:[#allocation2] sm:$0xf] }
  0x9b   :  { %86 = vmatpush.bf16.xpose.msra.mxu0 %v77_v30 }
  0xa2   :  { %87 = vmatmul.bf16.vlgmr.msra.gmra.mxu0 %v78_v31 }
  0xd9   :  { %v154_v47 = vpop.xlane.xlu2 %153 }
  0xda   :  { %v155_v49 = vadd.f32 %v154_v47, %v151_v48 }
  0xdc   :  { %156 = vst.msk [vmem:[#allocation6] sm:$0xff] %vm56_vm7, %v155_v49 }
  0xe3   :  { %v160_v52 = vld [vmem:[#allocation6] sm:$0xff] }
  0xe4   :  { %vm162_vm13 = vcmp.gt.f32.partialorder %v160_v52, 0.0 }
  0xe5   :  { %v192_v54 = vsel %vm162_vm13, 1.0, %v252_v33  ;;  %v172_v62 = vsel %vm162_vm13, %v160_v52, 1.0 }
  0xe6   :  { %193 = vst.msk [vmem:[%s336_s5] sm:$0xff] %vm56_vm7, %v192_v54  ;;  %vm178_vm14 = vweird.f32 %v172_v62  ;;  %v184_v13 = vand.u32 2147483648, %v172_v62  ;;  %v182_v16 = vand.u32 2147483647, %v172_v62 }
  0xe8   :  { %v185_v19 = vor.u32 1.1754944e-38, %v184_v13  ;;  %vm183_vm1 = vcmp.eq.f32.partialorder %v182_v16, 8.507059e+37 }
 0x11f   :  { %v88_v34 = vpop.f32.mrf.mxu0 }
 0x120   :  { %v92_v35 = vmul.f32 2.0, %v88_v34 }
 0x122   :  { %v112_v36 = vsel %vm103_vm9, %v92_v35, -1e+30 }
 0x123   :  { %v118_v37 = vsel %vm117_vm8, %v112_v36, -inf  ;;  %v145_v59 = vmul.f32 %v116_v41, %v112_v36 }
 0x124   :  { %119 = vmax.xlane.f32.xlu1 %v118_v37 }
 0x125   :  { %v146_v60 = vsel %vm117_vm8, %v145_v59, 0.0 }
 0x127   :  { %v90_v38 = vpop.f32.mrf.mxu0 }
 0x197   :  { %v120_v44 = vpop.xlane.xlu1 %119 }
 0x198   :  { %v122_v45 = vmax.f32 %v121_v43, %v120_v44 }
 0x19a   :  { %v123_v46 = vsub.f32 %v121_v43, %v122_v45  ;;  %143 = vst.msk [vmem:[#allocation3] sm:$0xff] %vm56_vm7, %v122_v45  ;;  %128 = vperm.xlu1 %207, %v122_v45  }
 0x19c   :  { %v124_v61 = vmul.f32 1.442695, %v123_v46 }
 0x1a1   :  { %v165_v17 = vld [vmem:[#allocation3] sm:$0xff] }
 0x20c   :  { %v129_v50 = vpop.permute.xlu1 %128 }
 0x20d   :  { %v131_v51 = vsub.f32 %v112_v36, %v129_v50 }
 0x20f   :  { %v132_v53 = vmul.f32 1.442695, %v131_v51 }
 0x211   :  { %215 = vpow2.f32 %v132_v53 }
 0x212   :  { %217 = vpow2.f32 %v124_v61 }
 0x213   :  { %219 = vrcp.f32 %v172_v62 }
 0x217   :  { %v216_v56 = vpop.eup %215 }
 0x218   :  { %v136_v57 = vmul.f32 %v216_v56, %v113_v55  ;;  %v218_v63 = vpop.eup %217 }
 0x219   :  { %v135_v1 = vmul.f32 %v218_v63, %v134_v0  ;;  %v220_v4 = vpop.eup %219 }
 0x21a   :  { %v137_v58 = vsel %vm117_vm8, %v136_v57, 0.0  ;;  %v174_v5 = vmul.f32 %v220_v4, %v172_v62  ;;  %vm179_vm15 = vweird.f32 %v220_v4 }
 0x21b   :  { %138 = vadd.xlane.f32.xlu0 %v137_v58  ;;  %vm180_vm0 = vmor %vm178_vm14, %vm179_vm15 }
 0x21c   :  { %v175_v9 = vsub.f32 1.0, %v174_v5 }
 0x21e   :  { %v176_v11 = vmul.f32 %v220_v4, %v175_v9 }
 0x220   :  { %v177_v15 = vadd.f32 %v220_v4, %v176_v11 }
 0x222   :  { %v181_v20 = vsel %vm180_vm0, %v220_v4, %v177_v15 }
 0x223   :  { %147 = vadd.xlane.f32.xlu0 %v146_v60  ;;  %v186_v24 = vsel %vm183_vm1, %v185_v19, %v181_v20 }
 0x28e   :  { %v139_v2 = vpop.xlane.xlu0 %138 }
 0x28f   :  { %v140_v3 = vadd.f32 %v139_v2, %v135_v1 }
 0x291   :  { %142 = vst.msk [vmem:[#allocation4] sm:$0xff] %vm56_vm7, %v140_v3 }
 0x296   :  { %v148_v7 = vpop.xlane.xlu0 %147 }
 0x297   :  { %v149_v8 = vadd.f32 %v148_v7, %v144_v6 }
 0x298   :  { %v166_v10 = vld [vmem:[#allocation4] sm:$0xff] }
 0x299   :  { %221 = vlog2.f32 %v166_v10  ;;  %150 = vst.msk [vmem:[#allocation5] sm:$0xff] %vm56_vm7, %v149_v8 }
 0x29f   :  { %v222_v12 = vpop.eup %221 }
 0x2a0   :  { %v168_v14 = vmul.f32 0.6931472, %v222_v12  ;;  %v164_v22 = vld [vmem:[#allocation5] sm:$0xff] }
 0x2a2   :  { %v169_v18 = vadd.f32 %v168_v14, %v165_v17 }
 0x2a4   :  { %v170_v21 = vmul.f32 %v169_v18, %v160_v52 }
 0x2a6   :  { %v171_v23 = vsub.f32 %v164_v22, %v170_v21 }
 0x2a8   :  { %v187_v25 = vmul.f32 %v186_v24, %v171_v23 }
 0x2aa   :  { %v188_v26 = vsel %vm162_vm13, %v187_v25, 0.0 }
 0x2ab   :  { %v189_v27 = vsub.f32 0.0, %v188_v26 }
 0x2ad   :  { %v190_v28 = vmul.f32 0.5, %v189_v27 }
 0x2af   :  { %191 = vst.msk [vmem:[%s335_s4] sm:$0xff] %vm56_vm7, %v190_v28 }
 0x2b0   :  { %202 = vsyncpa [#allocation8], 1 }

</bundles_post_ra>
